<compile_context>
chip_gen: v7x
topology: tpu7x:2x2x1
jax: 0.10.0
libtpu: 0.0.40
codegen_flags: <defaults>
</compile_context>

<pallas_src>
import jax
import jax.numpy as jnp
from jax.experimental import pallas as pl
from jax.experimental.pallas import tpu as pltpu

_BN_EPS = 1e-5
_LRELU_SLOPE = 0.01


def _conv_stage_kernel(x_ref, halo_ref, w_ref, mu_ref, isd_ref, o_ref):
    """Fused BN(affine=False) + LeakyReLU + reflect-pad k=3 Conv1d (no bias).

    x_ref:    (Bb, C_in, TL)    activation tile (storage/compute dtype)
    halo_ref: (Bb, 1, C_in, 2)  left/right neighbour element of this L-tile
    w_ref:    (3, C_out, C_in)  conv weight, tap-major
    mu_ref:   (C_in, 1) f32     BN batch mean
    isd_ref:  (C_in, 1) f32     BN 1/sqrt(var + eps)
    o_ref:    (Bb, C_out, TL)
    """
    mu = mu_ref[...]
    isd = isd_ref[...]
    wk0 = w_ref[0]
    wk1 = w_ref[1]
    wk2 = w_ref[2]
    cdt = wk0.dtype
    n_batch = x_ref.shape[0]

    def bn_lrelu(v):
        v = (v.astype(jnp.float32) - mu) * isd
        return jnp.where(v >= 0, v, _LRELU_SLOPE * v)

    for b in range(n_batch):            # small static unroll; the DMA is already batched
        a = bn_lrelu(x_ref[b])          # (C_in, TL) f32
        ah = bn_lrelu(halo_ref[b, 0])   # (C_in, 2)  f32
        # Taps of the reflect-padded activation restricted to this tile:
        a_l = jnp.concatenate([ah[:, 0:1], a[:, :-1]], axis=1)   # a_pad[:, l + 0]
        a_r = jnp.concatenate([a[:, 1:], ah[:, 1:2]], axis=1)    # a_pad[:, l + 2]
        y = (jnp.dot(wk0, a_l.astype(cdt), preferred_element_type=jnp.float32)
             + jnp.dot(wk1, a.astype(cdt), preferred_element_type=jnp.float32)
             + jnp.dot(wk2, a_r.astype(cdt), preferred_element_type=jnp.float32))
        o_ref[b] = y.astype(o_ref.dtype)


def _pick_tile_l(length, max_tile=2048):
    """Lane-dense L tile: multiple of 128 (512-2048 preferred) or the full length."""
    if length <= max_tile:
        return length
    for t in (2048, 1024, 512, 256, 128):
        if length % t == 0:
            return t
    # TODO(synk): ragged L (not a multiple of 128) falls back to one full-length tile.
    return length


def _pick_batch_block(n, c_in, c_out, tile_l, itemsize, vmem_budget=8 * 1024 * 1024):
    """Batch rows per grid step, budgeted against double-buffered VMEM tiles."""
    per_sample = (c_in + c_out) * tile_l * itemsize * 2
    b = int(max(1, min(n, 8, vmem_budget // max(per_sample, 1))))
    while n % b:
        b -= 1
    return b


def _conv_stage(x, w_taps, mu, isd, *, out_dtype):
    """One fused (BN -> LeakyReLU -> reflect-pad conv, k=3, stride 1) stage.

    x:      (N, C_in, L)       storage/compute dtype
    w_taps: (3, C_out, C_in)   matmul-operand dtype
    mu/isd: (C_in, 1) float32
    """
    n, c_in, length = x.shape
    k, c_out, _ = w_taps.shape
    assert k == 3, "only kernel_size=3 (module default) is implemented"

    tile_l = _pick_tile_l(length)
    if length % tile_l == 0:
        n_tiles = length // tile_l
    else:
        tile_l, n_tiles = length, 1
    bb = _pick_batch_block(n, c_in, c_out, tile_l, jnp.dtype(x.dtype).itemsize)

    # Per-tile halo (reflect boundary); keeps the big L tiles non-overlapping in HBM.
    x_pad = jnp.pad(x, ((0, 0), (0, 0), (1, 1)), mode="reflect")      # (N, C, L+2)
    starts = jnp.arange(n_tiles) * tile_l
    halo = jnp.stack(
        [x_pad[:, :, starts], x_pad[:, :, starts + tile_l + 1]], axis=-1
    )                                                                 # (N, C, nT, 2)
    halo = jnp.transpose(halo, (0, 2, 1, 3))                          # (N, nT, C, 2)

    flops = 2 * n * c_out * c_in * k * length
    bytes_accessed = (
        x.size * x.dtype.itemsize
        + halo.size * halo.dtype.itemsize
        + w_taps.size * w_taps.dtype.itemsize
        + n * c_out * length * jnp.dtype(out_dtype).itemsize
    )

    return pl.pallas_call(
        _conv_stage_kernel,
        out_shape=jax.ShapeDtypeStruct((n, c_out, length), out_dtype),
        grid_spec=pltpu.PrefetchScalarGridSpec(
            num_scalar_prefetch=0,
            grid=(n // bb, n_tiles),
            in_specs=[
                pl.BlockSpec((bb, c_in, tile_l), lambda nb, t: (nb, 0, t)),
                pl.BlockSpec((bb, 1, c_in, 2), lambda nb, t: (nb, t, 0, 0)),
                pl.BlockSpec((k, c_out, c_in), lambda nb, t: (0, 0, 0)),
                pl.BlockSpec((c_in, 1), lambda nb, t: (0, 0)),
                pl.BlockSpec((c_in, 1), lambda nb, t: (0, 0)),
            ],
            out_specs=pl.BlockSpec((bb, c_out, tile_l), lambda nb, t: (nb, 0, t)),
        ),
        compiler_params=pltpu.CompilerParams(
            dimension_semantics=("parallel", "parallel")
        ),
        cost_estimate=pl.CostEstimate(
            flops=flops, transcendentals=0, bytes_accessed=bytes_accessed
        ),
    )(x, halo, w_taps, mu, isd)


def _bn_stats(x):
    """Training-mode BatchNorm1d stats per channel (biased variance), in f32."""
    xf = x.astype(jnp.float32)
    mean = jnp.mean(xf, axis=(0, 2))
    var = jnp.mean((xf - mean[None, :, None]) ** 2, axis=(0, 2))
    inv_std = jax.lax.rsqrt(var + _BN_EPS)
    return mean[:, None], inv_std[:, None]


def residual_conv_forward(x, w1, w2, *, compute_dtype=jnp.bfloat16):
    """ResidualConv(downsample=False) forward.

    x:  (N, C_in, L) float32
    w1: (C_mid, C_in, 3) float32   (torch Conv1d weight layout)
    w2: (C_out, C_mid, 3) float32
    returns (N, C_out, L) float32
    """
    w1_taps = jnp.transpose(w1, (2, 0, 1)).astype(compute_dtype)   # (3, C_mid, C_in)
    w2_taps = jnp.transpose(w2, (2, 0, 1)).astype(compute_dtype)   # (3, C_out, C_mid)

    mu1, isd1 = _bn_stats(x)                                 # stats from the f32 input
    h = _conv_stage(x.astype(compute_dtype), w1_taps, mu1, isd1,
                    out_dtype=compute_dtype)                 # intermediate stays narrow
    mu2, isd2 = _bn_stats(h)
    y = _conv_stage(h, w2_taps, mu2, isd2, out_dtype=jnp.float32)
    return y


def _ref_forward(x, w1, w2):
    """Pure-JAX f32 reference matching the PyTorch module (training-mode BN)."""
    def bn_lrelu(v):
        mean = jnp.mean(v, axis=(0, 2), keepdims=True)
        var = jnp.mean((v - mean) ** 2, axis=(0, 2), keepdims=True)
        vn = (v - mean) * jax.lax.rsqrt(var + _BN_EPS)
        return jnp.where(vn >= 0, vn, _LRELU_SLOPE * vn)

    def conv(v, w):
        vp = jnp.pad(v, ((0, 0), (0, 0), (1, 1)), mode="reflect")
        return jax.lax.conv_general_dilated(
            vp, w, window_strides=(1,), padding="VALID",
            dimension_numbers=("NCH", "OIH", "NCH"))

    h = conv(bn_lrelu(x), w1)
    return conv(bn_lrelu(h), w2)


if __name__ == "__main__":
    key = jax.random.PRNGKey(0)
    kx, k1, k2 = jax.random.split(key, 3)

    n, c_in, c_mid, c_out, length = 2, 4, 6, 6, 256
    x = jax.random.normal(kx, (n, c_in, length), dtype=jnp.float32)
    w1 = jax.random.normal(k1, (c_mid, c_in, 3), dtype=jnp.float32) * 0.3
    w2 = jax.random.normal(k2, (c_out, c_mid, 3), dtype=jnp.float32) * 0.3

    ref = _ref_forward(x, w1, w2)

    # f32 path: tight correctness check against the pure-JAX reference.
    out_f32 = jax.block_until_ready(
        residual_conv_forward(x, w1, w2, compute_dtype=jnp.float32))
    assert out_f32.shape == (n, c_out, length)
    assert jnp.allclose(out_f32, ref, atol=1e-4, rtol=1e-4), float(
        jnp.max(jnp.abs(out_f32 - ref)))

    # bf16 path (halved HBM traffic, f32 accumulation): loose sanity check.
    out_bf16 = jax.block_until_ready(
        residual_conv_forward(x, w1, w2, compute_dtype=jnp.bfloat16))
    assert out_bf16.shape == (n, c_out, length)
    assert jnp.allclose(out_bf16, ref, atol=1e-1, rtol=1e-1)

    print("KERNEL_OK")
</pallas_src>

<mosaic_0001>
module attributes {stable_mosaic.version = 11 : i64} {
  func.func @_conv_stage_kernel(%arg0: i32, %arg1: i32, %arg2: memref<2x4x256xf32, #tpu.memory_space<vmem>>, %arg3: memref<2x1x4x2xf32, #tpu.memory_space<vmem>>, %arg4: memref<3x6x4xf32, #tpu.memory_space<vmem>>, %arg5: memref<4x1xf32, #tpu.memory_space<vmem>>, %arg6: memref<4x1xf32, #tpu.memory_space<vmem>>, %arg7: memref<2x6x256xf32, #tpu.memory_space<vmem>>) attributes {dimension_semantics = [#tpu.dimension_semantics<parallel>, #tpu.dimension_semantics<parallel>], iteration_bounds = array<i64: 1, 1>, scalar_prefetch = 0 : i64, scratch_operands = 0 : i64, tpu.core_type = #tpu.core_type<tc>, window_params = [{transform_indices = @transform_0, window_bounds = array<i64: 2, 4, 256>}, {transform_indices = @transform_1, window_bounds = array<i64: 2, 1, 4, 2>}, {pipeline_mode = #tpu.pipeline_mode<synchronous>, transform_indices = @transform_2, window_bounds = array<i64: 3, 6, 4>}, {pipeline_mode = #tpu.pipeline_mode<synchronous>, transform_indices = @transform_3, window_bounds = array<i64: 4, 1>}, {pipeline_mode = #tpu.pipeline_mode<synchronous>, transform_indices = @transform_4, window_bounds = array<i64: 4, 1>}, {transform_indices = @transform_5, window_bounds = array<i64: 2, 6, 256>}]} {
    %c0 = arith.constant 0 : index
    %c0_0 = arith.constant 0 : index
    %0 = vector.load %arg5[%c0, %c0_0] : memref<4x1xf32, #tpu.memory_space<vmem>>, vector<4x1xf32>
    %c0_1 = arith.constant 0 : index
    %c0_2 = arith.constant 0 : index
    %1 = vector.load %arg6[%c0_1, %c0_2] : memref<4x1xf32, #tpu.memory_space<vmem>>, vector<4x1xf32>
    %c0_3 = arith.constant 0 : index
    %c0_4 = arith.constant 0 : index
    %c0_5 = arith.constant 0 : index
    %2 = vector.load %arg4[%c0_3, %c0_4, %c0_5] : memref<3x6x4xf32, #tpu.memory_space<vmem>>, vector<1x6x4xf32>
    %3 = vector.shape_cast %2 : vector<1x6x4xf32> to vector<6x4xf32>
    %c1 = arith.constant 1 : index
    %c0_6 = arith.constant 0 : index
    %c0_7 = arith.constant 0 : index
    %4 = vector.load %arg4[%c1, %c0_6, %c0_7] : memref<3x6x4xf32, #tpu.memory_space<vmem>>, vector<1x6x4xf32>
    %5 = vector.shape_cast %4 : vector<1x6x4xf32> to vector<6x4xf32>
    %c2 = arith.constant 2 : index
    %c0_8 = arith.constant 0 : index
    %c0_9 = arith.constant 0 : index
    %6 = vector.load %arg4[%c2, %c0_8, %c0_9] : memref<3x6x4xf32, #tpu.memory_space<vmem>>, vector<1x6x4xf32>
    %7 = vector.shape_cast %6 : vector<1x6x4xf32> to vector<6x4xf32>
    %c0_10 = arith.constant 0 : index
    %c0_11 = arith.constant 0 : index
    %c0_12 = arith.constant 0 : index
    %8 = vector.load %arg2[%c0_10, %c0_11, %c0_12] : memref<2x4x256xf32, #tpu.memory_space<vmem>>, vector<1x4x256xf32>
    %9 = vector.shape_cast %8 : vector<1x4x256xf32> to vector<4x256xf32>
    %10 = vector.broadcast %0 : vector<4x1xf32> to vector<4x256xf32>
    %11 = arith.subf %9, %10 : vector<4x256xf32>
    %12 = vector.broadcast %1 : vector<4x1xf32> to vector<4x256xf32>
    %13 = arith.mulf %11, %12 : vector<4x256xf32>
    %cst = arith.constant 0.000000e+00 : f32
    %14 = vector.broadcast %cst : f32 to vector<4x256xf32>
    %15 = arith.cmpf oge, %13, %14 : vector<4x256xf32>
    %cst_13 = arith.constant 0.00999999977 : f32
    %16 = vector.broadcast %cst_13 : f32 to vector<4x256xf32>
    %17 = arith.mulf %16, %13 : vector<4x256xf32>
    %18 = arith.select %15, %13, %17 : vector<4x256xi1>, vector<4x256xf32>
    %c0_14 = arith.constant 0 : index
    %c0_15 = arith.constant 0 : index
    %c0_16 = arith.constant 0 : index
    %c0_17 = arith.constant 0 : index
    %19 = vector.load %arg3[%c0_14, %c0_15, %c0_16, %c0_17] : memref<2x1x4x2xf32, #tpu.memory_space<vmem>>, vector<1x1x4x2xf32>
    %20 = vector.shape_cast %19 : vector<1x1x4x2xf32> to vector<4x2xf32>
    %21 = vector.broadcast %0 : vector<4x1xf32> to vector<4x2xf32>
    %22 = arith.subf %20, %21 : vector<4x2xf32>
    %23 = vector.broadcast %1 : vector<4x1xf32> to vector<4x2xf32>
    %24 = arith.mulf %22, %23 : vector<4x2xf32>
    %cst_18 = arith.constant 0.000000e+00 : f32
    %25 = vector.broadcast %cst_18 : f32 to vector<4x2xf32>
    %26 = arith.cmpf oge, %24, %25 : vector<4x2xf32>
    %cst_19 = arith.constant 0.00999999977 : f32
    %27 = vector.broadcast %cst_19 : f32 to vector<4x2xf32>
    %28 = arith.mulf %27, %24 : vector<4x2xf32>
    %29 = arith.select %26, %24, %28 : vector<4x2xi1>, vector<4x2xf32>
    %30 = vector.extract_strided_slice %29 {offsets = [0, 0], sizes = [4, 1], strides = [1, 1]} : vector<4x2xf32> to vector<4x1xf32>
    %31 = vector.extract_strided_slice %18 {offsets = [0, 0], sizes = [4, 255], strides = [1, 1]} : vector<4x256xf32> to vector<4x255xf32>
    %32 = tpu.concatenate %30, %31 in 1 : vector<4x1xf32>, vector<4x255xf32> -> vector<4x256xf32>
    %33 = vector.extract_strided_slice %18 {offsets = [0, 1], sizes = [4, 255], strides = [1, 1]} : vector<4x256xf32> to vector<4x255xf32>
    %34 = vector.extract_strided_slice %29 {offsets = [0, 1], sizes = [4, 1], strides = [1, 1]} : vector<4x2xf32> to vector<4x1xf32>
    %35 = tpu.concatenate %33, %34 in 1 : vector<4x255xf32>, vector<4x1xf32> -> vector<4x256xf32>
    %cst_20 = arith.constant dense<0.000000e+00> : vector<6x256xf32>
    %36 = tpu.matmul %3, %32, %cst_20 {dimension_numbers = #tpu.dot_dimension_numbers<[1], [0], [0], [1], [0, 0, 1, 1], [], []>} : vector<6x4xf32>, vector<4x256xf32>, vector<6x256xf32> -> vector<6x256xf32>
    %cst_21 = arith.constant dense<0.000000e+00> : vector<6x256xf32>
    %37 = tpu.matmul %5, %18, %cst_21 {dimension_numbers = #tpu.dot_dimension_numbers<[1], [0], [0], [1], [0, 0, 1, 1], [], []>} : vector<6x4xf32>, vector<4x256xf32>, vector<6x256xf32> -> vector<6x256xf32>
    %38 = arith.addf %36, %37 : vector<6x256xf32>
    %cst_22 = arith.constant dense<0.000000e+00> : vector<6x256xf32>
    %39 = tpu.matmul %7, %35, %cst_22 {dimension_numbers = #tpu.dot_dimension_numbers<[1], [0], [0], [1], [0, 0, 1, 1], [], []>} : vector<6x4xf32>, vector<4x256xf32>, vector<6x256xf32> -> vector<6x256xf32>
    %40 = arith.addf %38, %39 : vector<6x256xf32>
    %c0_23 = arith.constant 0 : index
    %c0_24 = arith.constant 0 : index
    %c0_25 = arith.constant 0 : index
    %41 = vector.load %arg7[%c0_23, %c0_24, %c0_25] : memref<2x6x256xf32, #tpu.memory_space<vmem>>, vector<1x6x256xf32>
    %42 = vector.shape_cast %41 : vector<1x6x256xf32> to vector<6x256xf32>
    %43 = vector.shape_cast %40 : vector<6x256xf32> to vector<1x6x256xf32>
    tpu.vector_store %arg7[%c0_23, %c0_24, %c0_25], %43 {strides = array<i32>} : memref<2x6x256xf32, #tpu.memory_space<vmem>>, vector<1x6x256xf32>,
    %c1_26 = arith.constant 1 : index
    %c0_27 = arith.constant 0 : index
    %c0_28 = arith.constant 0 : index
    %44 = vector.load %arg2[%c1_26, %c0_27, %c0_28] : memref<2x4x256xf32, #tpu.memory_space<vmem>>, vector<1x4x256xf32>
    %45 = vector.shape_cast %44 : vector<1x4x256xf32> to vector<4x256xf32>
    %46 = vector.broadcast %0 : vector<4x1xf32> to vector<4x256xf32>
    %47 = arith.subf %45, %46 : vector<4x256xf32>
    %48 = vector.broadcast %1 : vector<4x1xf32> to vector<4x256xf32>
    %49 = arith.mulf %47, %48 : vector<4x256xf32>
    %cst_29 = arith.constant 0.000000e+00 : f32
    %50 = vector.broadcast %cst_29 : f32 to vector<4x256xf32>
    %51 = arith.cmpf oge, %49, %50 : vector<4x256xf32>
    %cst_30 = arith.constant 0.00999999977 : f32
    %52 = vector.broadcast %cst_30 : f32 to vector<4x256xf32>
    %53 = arith.mulf %52, %49 : vector<4x256xf32>
    %54 = arith.select %51, %49, %53 : vector<4x256xi1>, vector<4x256xf32>
    %c1_31 = arith.constant 1 : index
    %c0_32 = arith.constant 0 : index
    %c0_33 = arith.constant 0 : index
    %c0_34 = arith.constant 0 : index
    %55 = vector.load %arg3[%c1_31, %c0_32, %c0_33, %c0_34] : memref<2x1x4x2xf32, #tpu.memory_space<vmem>>, vector<1x1x4x2xf32>
    %56 = vector.shape_cast %55 : vector<1x1x4x2xf32> to vector<4x2xf32>
    %57 = vector.broadcast %0 : vector<4x1xf32> to vector<4x2xf32>
    %58 = arith.subf %56, %57 : vector<4x2xf32>
    %59 = vector.broadcast %1 : vector<4x1xf32> to vector<4x2xf32>
    %60 = arith.mulf %58, %59 : vector<4x2xf32>
    %cst_35 = arith.constant 0.000000e+00 : f32
    %61 = vector.broadcast %cst_35 : f32 to vector<4x2xf32>
    %62 = arith.cmpf oge, %60, %61 : vector<4x2xf32>
    %cst_36 = arith.constant 0.00999999977 : f32
    %63 = vector.broadcast %cst_36 : f32 to vector<4x2xf32>
    %64 = arith.mulf %63, %60 : vector<4x2xf32>
    %65 = arith.select %62, %60, %64 : vector<4x2xi1>, vector<4x2xf32>
    %66 = vector.extract_strided_slice %65 {offsets = [0, 0], sizes = [4, 1], strides = [1, 1]} : vector<4x2xf32> to vector<4x1xf32>
    %67 = vector.extract_strided_slice %54 {offsets = [0, 0], sizes = [4, 255], strides = [1, 1]} : vector<4x256xf32> to vector<4x255xf32>
    %68 = tpu.concatenate %66, %67 in 1 : vector<4x1xf32>, vector<4x255xf32> -> vector<4x256xf32>
    %69 = vector.extract_strided_slice %54 {offsets = [0, 1], sizes = [4, 255], strides = [1, 1]} : vector<4x256xf32> to vector<4x255xf32>
    %70 = vector.extract_strided_slice %65 {offsets = [0, 1], sizes = [4, 1], strides = [1, 1]} : vector<4x2xf32> to vector<4x1xf32>
    %71 = tpu.concatenate %69, %70 in 1 : vector<4x255xf32>, vector<4x1xf32> -> vector<4x256xf32>
    %cst_37 = arith.constant dense<0.000000e+00> : vector<6x256xf32>
    %72 = tpu.matmul %3, %68, %cst_37 {dimension_numbers = #tpu.dot_dimension_numbers<[1], [0], [0], [1], [0, 0, 1, 1], [], []>} : vector<6x4xf32>, vector<4x256xf32>, vector<6x256xf32> -> vector<6x256xf32>
    %cst_38 = arith.constant dense<0.000000e+00> : vector<6x256xf32>
    %73 = tpu.matmul %5, %54, %cst_38 {dimension_numbers = #tpu.dot_dimension_numbers<[1], [0], [0], [1], [0, 0, 1, 1], [], []>} : vector<6x4xf32>, vector<4x256xf32>, vector<6x256xf32> -> vector<6x256xf32>
    %74 = arith.addf %72, %73 : vector<6x256xf32>
    %cst_39 = arith.constant dense<0.000000e+00> : vector<6x256xf32>
    %75 = tpu.matmul %7, %71, %cst_39 {dimension_numbers = #tpu.dot_dimension_numbers<[1], [0], [0], [1], [0, 0, 1, 1], [], []>} : vector<6x4xf32>, vector<4x256xf32>, vector<6x256xf32> -> vector<6x256xf32>
    %76 = arith.addf %74, %75 : vector<6x256xf32>
    %c1_40 = arith.constant 1 : index
    %c0_41 = arith.constant 0 : index
    %c0_42 = arith.constant 0 : index
    %77 = vector.load %arg7[%c1_40, %c0_41, %c0_42] : memref<2x6x256xf32, #tpu.memory_space<vmem>>, vector<1x6x256xf32>
    %78 = vector.shape_cast %77 : vector<1x6x256xf32> to vector<6x256xf32>
    %79 = vector.shape_cast %76 : vector<6x256xf32> to vector<1x6x256xf32>
    tpu.vector_store %arg7[%c1_40, %c0_41, %c0_42], %79 {strides = array<i32>} : memref<2x6x256xf32, #tpu.memory_space<vmem>>, vector<1x6x256xf32>,
    return
  }
  func.func @transform_0(%arg0: i32, %arg1: i32) -> (i32, i32, i32) {
    %c0_i32 = arith.constant 0 : i32
    %c0_i32_0 = arith.constant 0 : i32
    return %arg0, %c0_i32, %arg1 : i32, i32, i32
  }
  func.func @transform_1(%arg0: i32, %arg1: i32) -> (i32, i32, i32, i32) {
    %c0_i32 = arith.constant 0 : i32
    %c0_i32_0 = arith.constant 0 : i32
    %c0_i32_1 = arith.constant 0 : i32
    return %arg0, %arg1, %c0_i32, %c0_i32_0 : i32, i32, i32, i32
  }
  func.func @transform_2(%arg0: i32, %arg1: i32) -> (i32, i32, i32) {
    %c0_i32 = arith.constant 0 : i32
    %c0_i32_0 = arith.constant 0 : i32
    %c0_i32_1 = arith.constant 0 : i32
    %c0_i32_2 = arith.constant 0 : i32
    return %c0_i32, %c0_i32_0, %c0_i32_1 : i32, i32, i32
  }
  func.func @transform_3(%arg0: i32, %arg1: i32) -> (i32, i32) {
    %c0_i32 = arith.constant 0 : i32
    %c0_i32_0 = arith.constant 0 : i32
    %c0_i32_1 = arith.constant 0 : i32
    return %c0_i32, %c0_i32_0 : i32, i32
  }
  func.func @transform_4(%arg0: i32, %arg1: i32) -> (i32, i32) {
    %c0_i32 = arith.constant 0 : i32
    %c0_i32_0 = arith.constant 0 : i32
    %c0_i32_1 = arith.constant 0 : i32
    return %c0_i32, %c0_i32_0 : i32, i32
  }
  func.func @transform_5(%arg0: i32, %arg1: i32) -> (i32, i32, i32) {
    %c0_i32 = arith.constant 0 : i32
    %c0_i32_0 = arith.constant 0 : i32
    return %arg0, %c0_i32, %arg1 : i32, i32, i32
  }
}

</mosaic_0001>

<bundles_post_ra>
// kernel: tpu_custom_call.1
= control target key start
LH: loop header
LB: loop body
LE: loop exit
PB: predicated region body
PF: predicated region fallthrough
CT: control target
= control target key end

     0   :  { %v638_v0 = vmov 0   ;;  %v639_v3 = vmov 0.0   ;;  %v640_v4 = vmov 839922192   ;;  %v35_v6 = vlaneseq  ;;  %s641_s26 = smov 1   ;;  %s642_s30 = smov 127   ;;  %s741_s3 = inlined_call_operand.vmem [shape: f32[4,1], index: 3, kind: input, shape index: {}]   ;;  %s742_s4 = inlined_call_operand.vmem [shape: f32[4,1], index: 4, kind: input, shape index: {}]   ;;  %s743_s0 = inlined_call_operand.vmem [shape: f32[2,4,256], index: 0, kind: input, shape index: {}]   ;;  %s744_s1 = inlined_call_operand.vmem [shape: f32[2,1,4,2], index: 1, kind: input, shape index: {}]   ;;  %s745_s2 = inlined_call_operand.vmem [shape: f32[3,6,4], index: 2, kind: input, shape index: {}]   ;;  %s746_s5 = inlined_call_operand.vmem [shape: f32[2,6,256], index: 5, kind: output, shape index: {}]  }
   0x1   :  { %637 = vset.pattern.permute.xlu0 %v638_v0  ;;  %v20_v1 = vld [vmem:[%s741_s3] sm:$0xf]  ;;  %160 = vmatprep.mubr.f32.mxu0 %v639_v3  ;;  %v33_v5 = vunpack.c.l.s4 %v640_v4  ;;  %v610_v13 = vld [vmem:[%s743_s0 + $0x8] sm:$0xff]  ;;  %vm91_vm2 = vcmask 1043456   ;;  %v611_v28 = vld [vmem:[%s744_s1 + $0x4] sm:$0xf] }
   0x2   :  { %30 = vperm.xlu0 %637, %v20_v1   ;;  %v21_v2 = vld [vmem:[%s742_s4] sm:$0xf]  ;;  %431 = vmatprep.mubr.f32.mxu1 %v639_v3  ;;  %v36_v8 = vshrl.u32 %v35_v6, 7  ;;  %v599_v29 = vld [vmem:[%s745_s2 + $0x8] sm:$0x3f]  ;;  %vm87_vm3 = vcmask 31744  }
   0x3   :  { %v34_v7 = vunpack.c.0.s8 %v33_v5  ;;  %v27_v12 = vld [vmem:[%s743_s0] sm:$0xff]  ;;  %vm71_vm6 = vcmask 7168   ;;  %vm79_vm7 = vcmask 1039360   ;;  %v600_v52 = vld [vmem:[%s745_s2 + $0x10] sm:$0x3f] }
   0x4   :  { %v57_v22 = vld [vmem:[%s744_s1] sm:$0xf]  ;;  %s643_s1 = smov 126  }
   0x5   :  { %v37_v9 = vsub.s32 %v34_v7, %v36_v8  ;;  %v22_v42 = vld [vmem:[%s745_s2] sm:$0x3f] }
   0x6   :  { %43 = vperm.xlu0 %637, %v21_v2  }
  0x81   :  { %v31_v10 = vpop.permute.xlu0 %30 }
  0x82   :  { %v38_v11 = vrot.slane %v31_v10, %v37_v9  ;;  %v59_v27 = vsub.f32 %v57_v22, %v31_v10  ;;  %v338_v31 = vsub.f32 %v611_v28, %v31_v10 }
  0x84   :  { %v40_v15 = vsub.f32 %v27_v12, %v38_v11  ;;  %v331_v16 = vsub.f32 %v610_v13, %v38_v11 }
  0x85   :  { %v44_v14 = vpop.permute.xlu0 %43 }
  0x86   :  { %v51_v17 = vrot.slane %v44_v14, %v37_v9  ;;  %v61_v30 = vmul.f32 %v59_v27, %v44_v14  ;;  %v339_v32 = vmul.f32 %v338_v31, %v44_v14 }
  0x88   :  { %v53_v18 = vmul.f32 %v51_v17, %v40_v15  ;;  %v332_v19 = vmul.f32 %v331_v16, %v51_v17  ;;  %v63_v33 = vmul.f32 0.01, %v61_v30  ;;  %vm62_vm4 = vcmp.ge.f32.partialorder %v61_v30, 0.0 }
  0x89   :  { %v341_v35 = vmul.f32 0.01, %v339_v32  ;;  %vm340_vm5 = vcmp.ge.f32.partialorder %v339_v32, 0.0 }
  0x8a   :  { %vm333_vm0 = vcmp.ge.f32.partialorder %v332_v19, 0.0  ;;  %v334_v20 = vmul.f32 0.01, %v332_v19  ;;  %vm54_vm1 = vcmp.ge.f32.partialorder %v53_v18, 0.0  ;;  %v55_v21 = vmul.f32 0.01, %v53_v18 }
  0x8b   :  { %v64_v34 = vsel %vm62_vm4, %v61_v30, %v63_v33  ;;  %v342_v36 = vsel %vm340_vm5, %v339_v32, %v341_v35 }
  0x8c   :  { %v335_v23 = vsel %vm333_vm0, %v332_v19, %v334_v20  ;;  %v56_v24 = vsel %vm54_vm1, %v53_v18, %v55_v21 }
  0x8d   :  { %345 = vrot.lane.b32.xlu0 %v335_v23, %s641_s26  ;;  %67 = vrot.lane.b32.xlu1 %v56_v24, %s641_s26  ;;  %v66_v25 = vcombine.high %v56_v24, %v56_v24  ;;  %v344_v26 = vcombine.high %v335_v23, %v335_v23 }
  0x8f   :  { %601 = vmatprep.subr.msk.mxu0 %vm91_vm2, %v66_v25  ;;  %612 = vmatprep.subr.msk.mxu1 %vm91_vm2, %v344_v26 }
  0x90   :  { %602 = vmatpush1.msk.msra.mxu0 %vm91_vm2, %v56_v24  ;;  %613 = vmatpush1.msk.msra.mxu1 %vm91_vm2, %v335_v23 }
  0x91   :  { %77 = vrot.lane.b32.xlu0 %v66_v25, %s642_s30  ;;  %69 = vrot.lane.b32.xlu1 %v66_v25, %s641_s26 }
  0x92   :  { %603 = vmatmul.mubr.msk.f32.vlgmr.msra.gmra.mrb[0].mxu0 %vm87_vm3, %v599_v29  ;;  %614 = vmatmul.mubr.msk.f32.vlgmr.msra.gmra.mrb[0].mxu1 %vm87_vm3, %v599_v29 }
  0x93   :  { %239 = vmatprep.mubr.f32.mxu0 %v639_v3  ;;  %507 = vmatprep.mubr.f32.mxu1 %v639_v3 }
  0x95   :  { %354 = vrot.lane.b32.xlu0 %v344_v26, %s642_s30  ;;  %347 = vrot.lane.b32.xlu1 %v344_v26, %s641_s26 }
  0x99   :  { %75 = vrot.lane.b32.xlu0 %v56_v24, %s642_s30  ;;  %83 = vrot.lane.b32.xlu1 %v64_v34, %s643_s1 }
  0x9d   :  { %359 = vrot.lane.b32.xlu1 %v342_v36, %s643_s1 }
  0xa1   :  { %352 = vrot.lane.b32.xlu1 %v335_v23, %s642_s30 }
  0xff   :  { %v346_v37 = vpop.permute.xlu0 %345  ;;  %v68_v38 = vpop.permute.xlu1 %67 }
 0x100   :  { %v74_v43 = vsel %vm71_vm6, %v64_v34, %v68_v38  ;;  %v351_v47 = vsel %vm71_vm6, %v342_v36, %v346_v37 }
 0x103   :  { %v78_v39 = vpop.permute.xlu0 %77  ;;  %v70_v40 = vpop.permute.xlu1 %69 }
 0x104   :  { %v72_v41 = vsel %vm71_vm6, %v68_v38, %v70_v40 }
 0x105   :  { %604 = vmatprep.subr.msk.mxu0 %vm91_vm2, %v72_v41 }
 0x106   :  { %605 = vmatpush1.msk.msra.mxu0 %vm91_vm2, %v74_v43 }
 0x107   :  { %v355_v44 = vpop.permute.xlu0 %354  ;;  %v348_v45 = vpop.permute.xlu1 %347  ;;  %606 = vmatmul.mubr.msk.f32.vlgmr.msra.gmra.mrb[0].mxu0 %vm87_vm3, %v22_v42 }
 0x108   :  { %v349_v46 = vsel %vm71_vm6, %v346_v37, %v348_v45  ;;  %318 = vmatprep.mubr.f32.mxu0 %v639_v3 }
 0x109   :  { %615 = vmatprep.subr.msk.mxu1 %vm91_vm2, %v349_v46 }
 0x10a   :  { %616 = vmatpush1.msk.msra.mxu1 %vm91_vm2, %v351_v47 }
 0x10b   :  { %v76_v48 = vpop.permute.xlu0 %75  ;;  %v84_v49 = vpop.permute.xlu1 %83  ;;  %617 = vmatmul.mubr.msk.f32.vlgmr.msra.gmra.mrb[0].mxu1 %vm87_vm3, %v22_v42 }
 0x10c   :  { %v80_v50 = vsel %vm79_vm7, %v76_v48, %v78_v39  ;;  %v86_v51 = vsel %vm79_vm7, %v78_v39, %v84_v49  ;;  %583 = vmatprep.mubr.f32.mxu1 %v639_v3 }
 0x10d   :  { %607 = vmatprep.subr.msk.mxu0 %vm91_vm2, %v86_v51 }
 0x10e   :  { %608 = vmatpush1.msk.msra.mxu0 %vm91_vm2, %v80_v50 }
 0x10f   :  { %v360_v53 = vpop.permute.xlu1 %359  ;;  %609 = vmatmul.mubr.msk.f32.vlgmr.msra.gmra.mrb[0].mxu0 %vm87_vm3, %v600_v52 }
 0x110   :  { %v362_v54 = vsel %vm79_vm7, %v355_v44, %v360_v53 }
 0x111   :  { %618 = vmatprep.subr.msk.mxu1 %vm91_vm2, %v362_v54 }
 0x113   :  { %v353_v55 = vpop.permute.xlu1 %352 }
 0x114   :  { %v356_v56 = vsel %vm79_vm7, %v353_v55, %v355_v44 }
 0x115   :  { %619 = vmatpush1.msk.msra.mxu1 %vm91_vm2, %v356_v56 }
 0x116   :  { %620 = vmatmul.mubr.msk.f32.vlgmr.msra.gmra.mrb[0].mxu1 %vm87_vm3, %v600_v52 }
 0x1e2   :  { %v320_v57 = vpop.f32.mrb[0].mxu0 }
 0x1e3   :  { %327 = vst [vmem:[%s746_s5] sm:$0x3f] %v320_v57  ;;  %v322_v58 = vpop.f32.mrb[1].mxu0 }
 0x1e4   :  { %328 = vst [vmem:[%s746_s5 + $0x8] sm:$0x3f] %v322_v58 }
 0x1e9   :  { %v585_v59 = vpop.f32.mrb[0].mxu1 }
 0x1ea   :  { %621 = vst [vmem:[%s746_s5 + $0x10] sm:$0x3f] %v585_v59  ;;  %v587_v60 = vpop.f32.mrb[1].mxu1 }
 0x1eb   :  { %622 = vst [vmem:[%s746_s5 + $0x18] sm:$0x3f] %v587_v60 }

</bundles_post_ra>
